<compile_context>
chip_gen: v5e
topology: v5e:2x2
jax: 0.10.0
libtpu: 0.0.40
codegen_flags: <defaults>
</compile_context>

<pallas_src>
import math

import jax
import jax.numpy as jnp
from jax.experimental import pallas as pl
from jax.experimental.pallas import tpu as pltpu

_LANE = 128
_SUBLANE = 8


# ---------------------------------------------------------------------------
# Primary path: zero-DMA identity stub (no HBM read, no HBM write).
# ---------------------------------------------------------------------------
def _identity_stub_kernel(x_ref, o_ref):
    # The output buffer is aliased to the input buffer
    # (input_output_aliases={0: 0}), so it already holds x.  Emitting no
    # loads/stores means no HBM<->VMEM DMA is generated for this op.
    del x_ref, o_ref


def _identity_stub(x):
    return pl.pallas_call(
        _identity_stub_kernel,
        out_shape=jax.ShapeDtypeStruct(x.shape, x.dtype),
        in_specs=[pl.BlockSpec(memory_space=pl.ANY)],
        out_specs=pl.BlockSpec(memory_space=pl.ANY),
        input_output_aliases={0: 0},
    )(x)


# ---------------------------------------------------------------------------
# Fallback path: lane-dense tiled streaming copy (fresh output buffer).
# ---------------------------------------------------------------------------
def _copy_kernel(x_ref, o_ref):
    o_ref[...] = x_ref[...]


def _device_kind():
    try:
        return jax.devices()[0].device_kind.lower()
    except Exception:
        return ""


def _is_two_core_device():
    # v7x has 2 TensorCores per chip; v5e/v6e have 1.
    return "v7" in _device_kind()


def _per_block_budget_bytes():
    kind = _device_kind()
    if "v7" in kind:
        return 8 * 1024 * 1024
    if "v6" in kind or "trillium" in kind:
        return 6 * 1024 * 1024
    # v5e / unknown: double-buffered in+out (~4x block bytes) must stay under
    # the 16 MiB scoped-VMEM default.
    return 2 * 1024 * 1024


def _divisors(n):
    divs = set()
    i = 1
    while i * i <= n:
        if n % i == 0:
            divs.add(i)
            divs.add(n // i)
        i += 1
    return sorted(divs)


def _flatten_2d(shape, itemsize, budget_bytes):
    """Pick a (rows, cols) flattening with the widest lane-dense cols."""
    total = math.prod(shape) if len(shape) else 1
    if total == 0:
        return None
    max_cols = max(_LANE, budget_bytes // max(1, itemsize))
    if total % _LANE == 0:
        # Widest multiple of 128 that divides total and fits one block row.
        best = _LANE
        for d in _divisors(total // _LANE):
            cols = d * _LANE
            if best < cols <= max_cols:
                best = cols
        return total // best, best
    # Non-128-divisible totals (e.g. 13x13 / 26x26 YOLO grids): put the
    # largest divisor on the lane axis and use a full-extent lane block
    # (masked stores, but correct for any shape).
    best = 1
    for d in _divisors(total):
        if best < d <= max_cols:
            best = d
    return total // best, best


def _pick_tile_rows(rows, cols, itemsize, budget_bytes, split_for_two_cores):
    """Largest row tile (multiple of 8, or full extent) under the byte budget."""
    bytes_per_row = max(1, cols * itemsize)
    budget_rows = max(1, budget_bytes // bytes_per_row)
    if budget_rows >= rows:
        if split_for_two_cores and rows >= 2 * _SUBLANE:
            # Give the "parallel" grid axis >= 2 steps so both v7x
            # TensorCores get work (neutral on single-TC v5e/v6e).
            half = -(-rows // 2)
            half = ((half + _SUBLANE - 1) // _SUBLANE) * _SUBLANE
            return min(half, rows)
        return rows
    tile = max(_SUBLANE, (min(budget_rows, rows) // _SUBLANE) * _SUBLANE)
    return min(tile, rows)


def _tiled_copy(x):
    shape = x.shape
    itemsize = jnp.dtype(x.dtype).itemsize
    budget = _per_block_budget_bytes()
    flat = _flatten_2d(shape, itemsize, budget)
    if flat is None:          # zero-size tensor: nothing to copy
        return x
    rows, cols = flat
    x2d = x.reshape(rows, cols)
    tile_rows = _pick_tile_rows(rows, cols, itemsize, budget,
                                _is_two_core_device())
    grid = (pl.cdiv(rows, tile_rows),)
    # Headroom for double-buffered in+out blocks (~4x block bytes); always
    # well under physical VMEM (64 MiB on v7x, 128 MiB on v5e/v6e).
    vmem_limit = min(48 * 1024 * 1024, 4 * budget + 16 * 1024 * 1024)

    out2d = pl.pallas_call(
        _copy_kernel,
        out_shape=jax.ShapeDtypeStruct((rows, cols), x.dtype),
        grid_spec=pl.GridSpec(
            grid=grid,
            in_specs=[pl.BlockSpec((tile_rows, cols), lambda i: (i, 0))],
            out_specs=pl.BlockSpec((tile_rows, cols), lambda i: (i, 0)),
        ),
        compiler_params=pltpu.CompilerParams(
            dimension_semantics=("parallel",),
            vmem_limit_bytes=vmem_limit,
        ),
    )(x2d)
    return out2d.reshape(shape)


# ---------------------------------------------------------------------------
# Public wrapper mirroring YOLOLayer.forward.
# ---------------------------------------------------------------------------
def yolo_layer_forward(x, anchors=None, num_classes=80, img_dim=416,
                       force_copy=False):
    """Pallas implementation of YOLOLayer.forward (identity on x).

    anchors / num_classes / img_dim mirror the module's __init__ signature but
    do not affect forward().  For zero cost, donate x at the jit boundary
    (jax.jit(..., donate_argnums=0)) so the input/output alias removes the
    output allocation.  Use force_copy=True to materialize a fresh buffer via
    the streaming-copy kernel.
    """
    # TODO(synk): YOLOLayer training-time members (mse/bce losses, obj/noobj
    # scales, metrics) are not part of forward() and are not implemented.
    del anchors, num_classes, img_dim
    if force_copy:
        return _tiled_copy(x)
    return _identity_stub(x)


if __name__ == "__main__":
    key = jax.random.PRNGKey(0)
    anchors = [(10.0, 13.0), (16.0, 30.0), (33.0, 23.0)]
    num_classes = 80
    img_dim = 416

    # Small NCHW feature map consistent with a conv head feeding a YOLO layer.
    x = jax.random.normal(key, (2, 4, 16, 16), dtype=jnp.float32)
    x_host = jax.device_get(x)   # host copy for comparison (x may be donated)

    # 1) Primary zero-DMA path.  Donate x at the jit boundary so the alias
    #    actually removes the output allocation (no defensive copy).
    fwd = jax.jit(
        lambda a: yolo_layer_forward(a, anchors=anchors,
                                     num_classes=num_classes, img_dim=img_dim),
        donate_argnums=0,
    )
    try:
        y = jax.block_until_ready(fwd(x))
    except Exception:
        # TODO(synk): if the zero-DMA aliased stub ever fails to lower on an
        # older jax/libtpu, fall back to the streaming-copy kernel (identical
        # forward semantics).
        y = jax.block_until_ready(
            yolo_layer_forward(jnp.asarray(x_host), force_copy=True))
    assert y.shape == x_host.shape and y.dtype == jnp.float32
    assert bool(jnp.all(y == jnp.asarray(x_host)))

    # 2) Explicit streaming-copy path (fresh output buffer).
    x2 = jnp.asarray(x_host)
    y2 = jax.block_until_ready(yolo_layer_forward(x2, force_copy=True))
    assert y2.shape == x2.shape and bool(jnp.all(y2 == x2))

    # 3) Copy path on a non-128-divisible YOLO grid (13x13) to exercise the
    #    full-extent lane fallback layout.
    x3 = jax.random.normal(jax.random.PRNGKey(0), (1, 3, 13, 13), jnp.float32)
    y3 = jax.block_until_ready(yolo_layer_forward(x3, force_copy=True))
    assert y3.shape == x3.shape and bool(jnp.all(y3 == x3))

    print("KERNEL_OK")
</pallas_src>

<mosaic_0001>
module attributes {stable_mosaic.version = 11 : i64} {
  func.func @_identity_stub_kernel(%arg0: memref<2x4x16x16xf32, #tpu.memory_space<any>>, %arg1: memref<2x4x16x16xf32, #tpu.memory_space<any>>) attributes {dimension_semantics = [], scalar_prefetch = 0 : i64, scratch_operands = 0 : i64, tpu.core_type = #tpu.core_type<tc>} {
    return
  }
}

module attributes {stable_mosaic.version = 11 : i64} {
  func.func @_copy_kernel(%arg0: i32, %arg1: memref<1x2048xf32, #tpu.memory_space<vmem>>, %arg2: memref<1x2048xf32, #tpu.memory_space<vmem>>) attributes {dimension_semantics = [#tpu.dimension_semantics<parallel>], iteration_bounds = array<i64: 1>, scalar_prefetch = 0 : i64, scratch_operands = 0 : i64, tpu.core_type = #tpu.core_type<tc>, window_params = [{transform_indices = @transform_0, window_bounds = array<i64: 1, 2048>}, {transform_indices = @transform_1, window_bounds = array<i64: 1, 2048>}]} {
    %c0 = arith.constant 0 : index
    %c0_0 = arith.constant 0 : index
    %0 = vector.load %arg1[%c0, %c0_0] : memref<1x2048xf32, #tpu.memory_space<vmem>>, vector<1x2048xf32>
    %c0_1 = arith.constant 0 : index
    %c0_2 = arith.constant 0 : index
    %1 = vector.load %arg2[%c0_1, %c0_2] : memref<1x2048xf32, #tpu.memory_space<vmem>>, vector<1x2048xf32>
    tpu.vector_store %arg2[%c0_1, %c0_2], %0 {strides = array<i32>} : memref<1x2048xf32, #tpu.memory_space<vmem>>, vector<1x2048xf32>,
    return
  }
  func.func @transform_0(%arg0: i32) -> (i32, i32) {
    %c0_i32 = arith.constant 0 : i32
    %c0_i32_0 = arith.constant 0 : i32
    return %arg0, %c0_i32 : i32, i32
  }
  func.func @transform_1(%arg0: i32) -> (i32, i32) {
    %c0_i32 = arith.constant 0 : i32
    %c0_i32_0 = arith.constant 0 : i32
    return %arg0, %c0_i32 : i32, i32
  }
}

</mosaic_0001>

<bundles_post_ra>
// kernel: _lambda_.1
= control target key start
LH: loop header
LB: loop body
LE: loop exit
PB: predicated region body
PF: predicated region fallthrough
CT: control target
= control target key end

     0   :  { %s16_s0 = inlined_call_operand.hbm [shape: f32[2,4,16,16], index: 0, kind: input, shape index: {}, may-alias: {0,1}]   ;;  %s17_s1 = inlined_call_operand.hbm [shape: f32[2,4,16,16], index: 1, kind: output, shape index: {}, may-alias: {0,1}]  }

// kernel: tpu_custom_call.1
= control target key start
LH: loop header
LB: loop body
LE: loop exit
PB: predicated region body
PF: predicated region fallthrough
CT: control target
= control target key end

     0   :  { %6 = vsyncpa [#allocation3], 0  ;;  %s116_s0 = inlined_call_operand.hbm [shape: f32[1,2048], index: 0, kind: input, shape index: {}]   ;;  %s117_s1 = inlined_call_operand.hbm [shape: f32[1,2048], index: 1, kind: output, shape index: {}]  }
   0x1   :  { %7 = vsyncpa [#allocation4], 0  ;;  %s13_s8 = sshll.u32 %s116_s0, 4  ;;  %s98_s9 = smov [#allocation2]   ;;  %s14_s8 = int_to_ptr.hbm [resolvable:$true] %s13_s8 }
   0x2   :  { %s15_s10 = sshll.u32 %s98_s9, 4  ;;  %s16_s10 = int_to_ptr.vmem [resolvable:$true] %s15_s10 }
   0x3   :  { %18 = dma.hbm_to_vmem [thread:$0]  %s14_s8, 256, %s16_s10, [#allocation3]  }
   0x4   :  { %94 = dma.done.wait [#allocation3], 256  }
   0x5   :  { %95 = vsyncadd [#allocation3], 4294967040  ;;  %s99_s11 = smov [#allocation5]   ;;  %s34_s15 = sshll.u32 %s117_s1, 4  ;;  %v23_v0 = vld [vmem:[#allocation2] sm:$0xff]  ;;  %v24_v1 = vld [vmem:[#allocation2 + $0x8] sm:$0xff]  ;;  %s35_s15 = int_to_ptr.hbm [resolvable:$true] %s34_s15 }
   0x6   :  { %s32_s12 = sshll.u32 %s99_s11, 4  ;;  %25 = vst [vmem:[#allocation5] sm:$0xff] %v23_v0  ;;  %s33_s12 = int_to_ptr.vmem [resolvable:$true] %s32_s12 }
   0x7   :  { %26 = vst [vmem:[#allocation5 + $0x8] sm:$0xff] %v24_v1 }
   0x8   :  { %37 = dma.vmem_to_hbm [thread:$0]  %s33_s12, 256, %s35_s15, [#allocation4]  }
   0x9   :  { %96 = dma.done.wait [#allocation4], 256  }
   0xa   :  { %97 = vsyncadd [#allocation4], 4294967040 }
   0xb   :  { %42 = vsyncpa [#allocation3], 1 }
   0xc   :  { %43 = vsyncpa [#allocation4], 1 }

</bundles_post_ra>
